<compile_context>
chip_gen: v7x
topology: tpu7x:2x2x1
jax: 0.10.0
libtpu: 0.0.40
codegen_flags: <defaults>
</compile_context>

<pallas_src>
import jax
import jax.numpy as jnp
from jax.experimental import pallas as pl
from jax.experimental.pallas import tpu as pltpu


# ---------------------------------------------------------------------------
# Kernel bodies
# ---------------------------------------------------------------------------

def _scores(x, w):
    """Attention logits on the MXU: (BB, T, D) x (1, D) -> (BB, T, 1) f32.

    Bias omitted: softmax over T is shift-invariant, so adding the same scalar
    to every score cannot change the result.
    """
    bb, _, d = x.shape
    wb = jnp.broadcast_to(w[None, :, :], (bb, 1, d))        # (BB, 1, D)
    return jnp.einsum("btd,bkd->btk", x, wb,
                      preferred_element_type=jnp.float32)   # (BB, T, 1)


def _weighted_sum(x, e):
    """sum_t x[b,t,:] * e[b,t]  ->  (BB, D) f32, without an f32 copy of x."""
    bb, _, d = x.shape
    if x.dtype == jnp.float32:
        # VPU multiply + sublane reduce; lands directly in the (BB, D) layout.
        return jnp.sum(x * e, axis=1)
    # Sub-32-bit input: cast the small lane-1 weights (not x) and contract
    # over T on the MXU with f32 accumulation.
    part = jnp.einsum("btk,btd->bkd", e.astype(x.dtype), x,
                      preferred_element_type=jnp.float32)   # (BB, 1, D)
    return part.reshape(bb, d)


def attn_pool_kernel(x_ref, w_ref, o_ref):
    """Whole-sequence path: one grid step owns a (BB, T, D) batch block."""
    x = x_ref[...]                                  # (BB, T, D)
    w = w_ref[...]                                  # (1, D)

    s = _scores(x, w)                               # (BB, T, 1) f32
    m = jnp.max(s, axis=1, keepdims=True)           # (BB, 1, 1)
    e = jnp.exp(s - m)                              # (BB, T, 1) f32
    denom = jnp.sum(e, axis=1)                      # (BB, 1)

    pooled = _weighted_sum(x, e)                    # (BB, D) f32, unnormalized
    inv = pl.reciprocal(denom, approx=False)        # (BB, 1)
    o_ref[...] = (pooled * inv).astype(o_ref.dtype)


def attn_pool_tiled_kernel(x_ref, w_ref, o_ref, m_sc, l_sc, acc_sc):
    """T-tiled online-softmax (flash-style) path for large T*D.

    grid = (B/BB, T/TT); T axis is last and "arbitrary"; f32 m/l/acc
    accumulators live in VMEM scratch and persist across the T steps.
    """
    j = pl.program_id(1)

    @pl.when(j == 0)
    def _():
        m_sc[...] = jnp.full_like(m_sc, -jnp.inf)
        l_sc[...] = jnp.zeros_like(l_sc)
        acc_sc[...] = jnp.zeros_like(acc_sc)

    x = x_ref[...]                                  # (BB, TT, D)
    w = w_ref[...]                                  # (1, D)

    s = _scores(x, w)                               # (BB, TT, 1) f32
    m_prev = m_sc[...]                              # (BB, 1)
    m_new = jnp.maximum(m_prev, jnp.max(s, axis=1))
    alpha = jnp.exp(m_prev - m_new)                 # (BB, 1)
    e = jnp.exp(s - m_new[:, :, None])              # (BB, TT, 1)

    l_sc[...] = alpha * l_sc[...] + jnp.sum(e, axis=1)
    acc_sc[...] = alpha * acc_sc[...] + _weighted_sum(x, e)
    m_sc[...] = m_new

    @pl.when(j == pl.num_programs(1) - 1)
    def _():
        inv = pl.reciprocal(l_sc[...], approx=False)
        o_ref[...] = (acc_sc[...] * inv).astype(o_ref.dtype)


# ---------------------------------------------------------------------------
# Planning: block sizes, VMEM footprint, per-chip limits
# ---------------------------------------------------------------------------

def _vmem_capacity_bytes():
    try:
        return int(pltpu.get_tpu_info().vmem_capacity_bytes)
    except Exception:
        return 64 << 20          # conservative (v7x-sized) default


def _sublane_multiple(dtype):
    # f32 -> 8, bf16 -> 16, int8/fp8 -> 32 (sub-32-bit packs along sublanes).
    return 8 * (4 // jnp.dtype(dtype).itemsize)


def _round_up(n, m):
    return -(-n // m) * m


def _footprint_bytes(bb, tt, d, itemsize, tiled):
    """Peak VMEM estimate for one grid step, incl. double buffering and the
    128-lane padding of the (bb, tt, 1) f32 softmax intermediates."""
    x_blk = bb * tt * d * itemsize                       # one input block
    o_blk = bb * d * itemsize                            # one output block
    lane1 = bb * _round_up(tt, 8) * 128 * 4              # padded (bb, tt, 1) f32
    prod = bb * tt * d * 4 if itemsize == 4 else 0       # f32 x*e product (VPU path)
    row_pad = _round_up(bb, 8) * 128 * 4                 # padded (bb, 1) f32 buffer
    acc = bb * d * 4                                     # pooled / acc f32
    fp = 2 * x_blk + 2 * o_blk + 2 * lane1 + prod + acc + 4 * row_pad
    if tiled:
        fp += acc + 2 * row_pad                          # persistent m/l/acc scratch
    return fp + (1 << 20)                                # compiler-scratch slack


def _legal_bb(n, batch, sub):
    if batch <= sub or n >= batch:
        return batch
    return max(sub, (n // sub) * sub)


def _plan(batch, seq, d, itemsize, sub, target_bytes, fp_budget, split_cores):
    """Pick (bb, tt); tt == seq selects the whole-sequence (non-tiled) path."""
    row_bytes = max(1, seq * d * itemsize)

    bb_cap = _legal_bb(max(1, target_bytes // row_bytes), batch, sub)
    if split_cores and batch > sub:
        # Ensure >= 2 grid steps so both TensorCores of a 2-core chip stream.
        half = _round_up(-(-batch // 2), sub)
        if half < batch:
            bb_cap = min(bb_cap, half)

    # Candidate batch blocks, largest first, respecting the sublane rule.
    if batch <= sub:
        cands = [batch]
    else:
        cands = sorted({batch, *range(sub, batch, sub)}, reverse=True)
    cands = [c for c in cands if c <= bb_cap] or [min(cands)]

    for c in cands:
        if _footprint_bytes(c, seq, d, itemsize, tiled=False) <= fp_budget:
            return c, seq

    # Whole-T does not fit even at the smallest legal batch block: T-tiled path.
    bb = batch if batch <= sub else sub
    tts = [t for t in range(sub, seq, sub)
           if seq % t == 0
           and _footprint_bytes(bb, t, d, itemsize, tiled=True) <= fp_budget]
    if tts:
        under = [t for t in tts if bb * t * d * itemsize <= target_bytes]
        return bb, (max(under) if under else min(tts))

    # TODO(synk): T has no sublane-aligned divisor (or a single T-tile already
    # exceeds the budget); fall back to whole-T and rely on vmem_limit.
    return bb, seq


# ---------------------------------------------------------------------------
# Wrapper
# ---------------------------------------------------------------------------

def attentive_pooling(x, w, b=None, *, target_block_bytes=None,
                      block_b=None, block_t=None):
    """x: (B, T, D), w: (1, D), b: (1, 1) -> (B, D).

    `b` is accepted for API parity with nn.Linear(D, 1) but unused inside the
    kernel: softmax over T makes the scalar bias a mathematical no-op.
    """
    del b
    B, T, D = x.shape
    itemsize = jnp.dtype(x.dtype).itemsize
    sub = _sublane_multiple(x.dtype)

    vmem_cap = _vmem_capacity_bytes()
    small_vmem = vmem_cap <= (64 << 20)          # v7x-sized part (2 TensorCores)
    if target_block_bytes is None:
        target_block_bytes = (8 << 20) if small_vmem else (16 << 20)
    fp_budget = (36 << 20) if small_vmem else (96 << 20)
    vmem_cap_limit = (56 << 20) if small_vmem else (100 << 20)

    bb, tt = _plan(B, T, D, itemsize, sub, target_block_bytes, fp_budget,
                   split_cores=small_vmem)
    if block_b is not None:
        assert block_b == B or (block_b % sub == 0 and block_b <= B), (block_b, sub)
        bb = block_b
    if block_t is not None:
        assert block_t == T or (T % block_t == 0 and block_t % sub == 0), (block_t, sub)
        tt = block_t

    footprint = _footprint_bytes(bb, tt, D, itemsize, tiled=(tt < T))
    vmem_limit = int(min(vmem_cap_limit, max(32 << 20, footprint + (12 << 20))))

    if tt >= T:
        grid = (pl.cdiv(B, bb),)
        kernel = attn_pool_kernel
        in_specs = [pl.BlockSpec((bb, T, D), lambda i: (i, 0, 0)),
                    pl.BlockSpec((1, D), lambda i: (0, 0))]
        out_specs = pl.BlockSpec((bb, D), lambda i: (i, 0))
        scratch_shapes = []
        dims = ("parallel",)
    else:
        grid = (pl.cdiv(B, bb), T // tt)
        kernel = attn_pool_tiled_kernel
        in_specs = [pl.BlockSpec((bb, tt, D), lambda i, j: (i, j, 0)),
                    pl.BlockSpec((1, D), lambda i, j: (0, 0))]
        out_specs = pl.BlockSpec((bb, D), lambda i, j: (i, 0))
        scratch_shapes = [pltpu.VMEM((bb, 1), jnp.float32),
                          pltpu.VMEM((bb, 1), jnp.float32),
                          pltpu.VMEM((bb, D), jnp.float32)]
        dims = ("parallel", "arbitrary")

    return pl.pallas_call(
        kernel,
        out_shape=jax.ShapeDtypeStruct((B, D), x.dtype),
        grid_spec=pltpu.PrefetchScalarGridSpec(
            num_scalar_prefetch=0,
            grid=grid,
            in_specs=in_specs,
            out_specs=out_specs,
            scratch_shapes=scratch_shapes,
        ),
        compiler_params=pltpu.CompilerParams(
            dimension_semantics=dims,
            vmem_limit_bytes=vmem_limit,
        ),
    )(x, w)


# ---------------------------------------------------------------------------
# Reference + tests
# ---------------------------------------------------------------------------

def attentive_pooling_ref(x, w, b):
    xf = x.astype(jnp.float32)
    scores = jnp.einsum("btd,d->bt", xf, w[0].astype(jnp.float32))
    scores = scores + b.astype(jnp.float32)[0, 0]
    att = jax.nn.softmax(scores, axis=1)[..., None]
    return jnp.sum(xf * att, axis=1)                          # (B, D) f32


if __name__ == "__main__":
    key = jax.random.PRNGKey(0)

    def make_inputs(k, B, T, D, dtype):
        kx, kw, kb = jax.random.split(k, 3)
        bound = 1.0 / (D ** 0.5)
        # Deterministic Linear(D,1)-style init (uniform(-1/sqrt(D), 1/sqrt(D))).
        x = jax.random.normal(kx, (B, T, D), dtype=jnp.float32).astype(dtype)
        w = jax.random.uniform(kw, (1, D), minval=-bound, maxval=bound,
                               dtype=jnp.float32).astype(dtype)
        b = jax.random.uniform(kb, (1, 1), minval=-bound, maxval=bound,
                               dtype=jnp.float32).astype(dtype)
        return x, w, b

    tests = [
        # (shape, dtype, kwargs, tol)
        ((2, 8, 32), jnp.float32, {}, 1e-5),                            # main path
        ((10, 16, 64), jnp.float32, dict(block_b=8), 1e-5),             # partial batch block
        ((8, 32, 128), jnp.float32, dict(block_b=8, block_t=8), 1e-5),  # T-tiled online softmax
        ((4, 16, 128), jnp.bfloat16, {}, 3e-2),                         # MXU weighted-sum path
    ]
    keys = jax.random.split(key, len(tests))
    for tkey, ((B, T, D), dtype, kwargs, tol) in zip(keys, tests):
        x, w, b = make_inputs(tkey, B, T, D, dtype)
        out = jax.block_until_ready(attentive_pooling(x, w, b, **kwargs))
        ref = attentive_pooling_ref(x, w, b)
        assert out.shape == (B, D), (out.shape, (B, D))
        ok = jnp.allclose(out.astype(jnp.float32), ref, atol=tol, rtol=tol)
        assert ok, (B, T, D, str(dtype), kwargs)

    print("KERNEL_OK")
</pallas_src>

<mosaic_0001>
module attributes {stable_mosaic.version = 11 : i64} {
  func.func @attn_pool_kernel(%arg0: i32, %arg1: memref<2x8x32xf32, #tpu.memory_space<vmem>>, %arg2: memref<1x32xf32, #tpu.memory_space<vmem>>, %arg3: memref<2x32xf32, #tpu.memory_space<vmem>>) attributes {dimension_semantics = [#tpu.dimension_semantics<parallel>], iteration_bounds = array<i64: 1>, scalar_prefetch = 0 : i64, scratch_operands = 0 : i64, tpu.core_type = #tpu.core_type<tc>, window_params = [{transform_indices = @transform_0, window_bounds = array<i64: 2, 8, 32>}, {pipeline_mode = #tpu.pipeline_mode<synchronous>, transform_indices = @transform_1, window_bounds = array<i64: 1, 32>}, {transform_indices = @transform_2, window_bounds = array<i64: 2, 32>}]} {
    %c0 = arith.constant 0 : index
    %c0_0 = arith.constant 0 : index
    %c0_1 = arith.constant 0 : index
    %0 = vector.load %arg1[%c0, %c0_0, %c0_1] : memref<2x8x32xf32, #tpu.memory_space<vmem>>, vector<2x8x32xf32>
    %c0_2 = arith.constant 0 : index
    %c0_3 = arith.constant 0 : index
    %1 = vector.load %arg2[%c0_2, %c0_3] : memref<1x32xf32, #tpu.memory_space<vmem>>, vector<1x32xf32>
    %2 = vector.shape_cast %1 : vector<1x32xf32> to vector<1x1x32xf32>
    %3 = vector.shape_cast %2 : vector<1x1x32xf32> to vector<1x1x32xf32>
    %4 = vector.broadcast %3 : vector<1x1x32xf32> to vector<2x1x32xf32>
    "tpu.trace_start"() <{level = 10 : i32, message = "btd,bkd->btk"}> : () -> ()
    %cst = arith.constant dense<0.000000e+00> : vector<2x8x1xf32>
    %5 = tpu.matmul %0, %4, %cst {dimension_numbers = #tpu.dot_dimension_numbers<[2], [2], [1], [1], [0, 0, 0, 1, 1, 1], [0], [0]>} : vector<2x8x32xf32>, vector<2x1x32xf32>, vector<2x8x1xf32> -> vector<2x8x1xf32>
    "tpu.trace_stop"() : () -> ()
    %cst_4 = arith.constant dense<0xFF800000> : vector<2x1xf32>
    %6 = vector.multi_reduction <maximumf>, %5, %cst_4 [1] : vector<2x8x1xf32> to vector<2x1xf32>
    %7 = vector.shape_cast %6 : vector<2x1xf32> to vector<2x1x1xf32>
    %8 = vector.broadcast %7 : vector<2x1x1xf32> to vector<2x8x1xf32>
    %9 = arith.subf %5, %8 : vector<2x8x1xf32>
    %10 = math.exp %9 : vector<2x8x1xf32>
    %cst_5 = arith.constant dense<0.000000e+00> : vector<2x1xf32>
    %11 = vector.multi_reduction <add>, %10, %cst_5 [1] : vector<2x8x1xf32> to vector<2x1xf32>
    %12 = vector.broadcast %10 : vector<2x8x1xf32> to vector<2x8x32xf32>
    %13 = arith.mulf %0, %12 : vector<2x8x32xf32>
    %cst_6 = arith.constant dense<0.000000e+00> : vector<2x32xf32>
    %14 = vector.multi_reduction <add>, %13, %cst_6 [1] : vector<2x8x32xf32> to vector<2x32xf32>
    %15 = tpu.reciprocal %11 : vector<2x1xf32> -> vector<2x1xf32>
    %16 = vector.broadcast %15 : vector<2x1xf32> to vector<2x32xf32>
    %17 = arith.mulf %14, %16 : vector<2x32xf32>
    %c0_7 = arith.constant 0 : index
    %c0_8 = arith.constant 0 : index
    %18 = vector.load %arg3[%c0_7, %c0_8] : memref<2x32xf32, #tpu.memory_space<vmem>>, vector<2x32xf32>
    tpu.vector_store %arg3[%c0_7, %c0_8], %17 {strides = array<i32>} : memref<2x32xf32, #tpu.memory_space<vmem>>, vector<2x32xf32>,
    return
  }
  func.func @transform_0(%arg0: i32) -> (i32, i32, i32) {
    %c0_i32 = arith.constant 0 : i32
    %c0_i32_0 = arith.constant 0 : i32
    %c0_i32_1 = arith.constant 0 : i32
    return %arg0, %c0_i32, %c0_i32_0 : i32, i32, i32
  }
  func.func @transform_1(%arg0: i32) -> (i32, i32) {
    %c0_i32 = arith.constant 0 : i32
    %c0_i32_0 = arith.constant 0 : i32
    %c0_i32_1 = arith.constant 0 : i32
    return %c0_i32, %c0_i32_0 : i32, i32
  }
  func.func @transform_2(%arg0: i32) -> (i32, i32) {
    %c0_i32 = arith.constant 0 : i32
    %c0_i32_0 = arith.constant 0 : i32
    return %arg0, %c0_i32 : i32, i32
  }
}

</mosaic_0001>

<bundles_post_ra>
// kernel: tpu_custom_call.1
= control target key start
LH: loop header
LB: loop body
LE: loop exit
PB: predicated region body
PF: predicated region fallthrough
CT: control target
= control target key end

     0   :  { %7 = vsyncpa [#allocation3], 0  ;;  %s260_s0 = inlined_call_operand.hbm [shape: f32[2,8,32], index: 0, kind: input, shape index: {}]   ;;  %s261_s1 = inlined_call_operand.vmem [shape: f32[1,32], index: 1, kind: input, shape index: {}]   ;;  %s262_s2 = inlined_call_operand.hbm [shape: f32[2,32], index: 2, kind: output, shape index: {}]  }
   0x1   :  { %8 = vsyncpa [#allocation4], 0  ;;  %s205_s9 = smov [#allocation2]   ;;  %s157_s13 = scalar_lea.hbm %s260_s0, 256 }
   0x2   :  { %s14_s10 = sshll.u32 %s205_s9, 4  ;;  %p158_p0 = scmp.ne.s32.totalorder %s260_s0, %s157_s13  ;;  %s15_s10 = int_to_ptr.vmem [resolvable:$true] %s14_s10 }
   0x3   :  { %p161_p1 = scmp.lt.u32.totalorder %s157_s13, %s260_s0 }
   0x5   :  { %p163_p2 = pnand %p161_p1, %p158_p0 }
   0x7   :  { %166 = shalt.err (!%p163_p2)
}
   0x8   :  { %s167_s18 = scalar_lea.vmem %s15_s10, 256  ;;  %p172_p4 = scmp.lt.s32.totalorder %s15_s10, %s15_s10 }
   0x9   :  { %p168_p3 = scmp.ne.s32.totalorder %s15_s10, %s167_s18  ;;  %p173_p5 = scmp.lt.s32.totalorder %s167_s18, %s167_s18 }
   0xb   :  { %p174_p6 = por %p173_p5, %p172_p4 }
   0xd   :  { %p175_p7 = pnand %p174_p6, %p168_p3 }
   0xf   :  { %178 = shalt.err (!%p175_p7)
}
  0x10   :  { %s206_s19 = smov 128   ;;  %s207_s20 = smov 8  }
  0x11   :  { %20 = dma.hbm_to_vmem [thread:$0]  %s260_s0, 256, %s15_s10, [#allocation3], %s206_s19, %s206_s19, %s207_s20  }
  0x12   :  { %201 = dma.done.wait [#allocation3], 256  }
  0x13   :  { %202 = vsyncadd [#allocation3], 4294967040  ;;  %v26_v0 = vld [vmem:[#allocation2] sm:$0xff]  ;;  %vm36_vm0 = vcmask 261120   ;;  %v27_v2 = vld [vmem:[#allocation2 + $0x8] sm:$0xff]  ;;  %v208_v7 = vmov 0  }
  0x14   :  { %v141_v1 = vld [vmem:[%s261_s1] ss:$0 sm:$0xff]  ;;  %147 = vset.pattern.permute.xlu1 %v208_v7  ;;  %148 = vset.pattern.permute.xlu0 %v208_v7  ;;  %vm44_vm1 = vcmask 7168   ;;  %s209_s0 = smov [#allocation5]   ;;  %vm121_vm2 = vcmask 1041409   ;;  %vm124_vm3 = vcmask 254976  }
  0x15   :  { %v35_v3 = vmul.f32 %v141_v1, %v26_v0  ;;  %v40_v4 = vmul.f32 %v141_v1, %v27_v2  ;;  %s132_s1 = sshll.u32 %s209_s0, 4  ;;  %s133_s1 = int_to_ptr.vmem [resolvable:$true] %s132_s1 }
  0x16   :  { %s179_s25 = scalar_lea.vmem %s133_s1, 32  ;;  %p184_p9 = scmp.lt.s32.totalorder %s133_s1, %s133_s1 }
  0x17   :  { %v37_v5 = vsel %vm36_vm0, %v35_v3, 0.0  ;;  %v41_v6 = vsel %vm36_vm0, %v40_v4, 0.0  ;;  %p180_p8 = scmp.ne.s32.totalorder %s133_s1, %s179_s25  ;;  %p185_p10 = scmp.lt.s32.totalorder %s179_s25, %s179_s25 }
  0x18   :  { %38 = vadd.xlane.f32.xlu0 %v37_v5 }
  0x19   :  { %p186_p11 = por %p185_p10, %p184_p9 }
  0x1b   :  { %p187_p12 = pnand %p186_p11, %p180_p8 }
  0x1c   :  { %42 = vadd.xlane.f32.xlu0 %v41_v6 }
  0xa5   :  { %v39_v8 = vpop.xlane.xlu0 %38 }
  0xa6   :  { %v45_v9 = vsel %vm44_vm1, %v39_v8, -inf }
  0xa7   :  { %v46_v10 = vrot.slane %v45_v9, 4 }
  0xa9   :  { %v47_v11 = vmax.f32 %v45_v9, %v46_v10  ;;  %v43_v12 = vpop.xlane.xlu0 %42 }
  0xaa   :  { %v52_v13 = vsel %vm44_vm1, %v43_v12, -inf }
  0xab   :  { %v48_v14 = vrot.slane %v47_v11, 2  ;;  %v53_v15 = vrot.slane %v52_v13, 4 }
  0xad   :  { %v49_v16 = vmax.f32 %v47_v11, %v48_v14  ;;  %v54_v17 = vmax.f32 %v52_v13, %v53_v15 }
  0xaf   :  { %v50_v18 = vrot.slane %v49_v16, 1  ;;  %v55_v19 = vrot.slane %v54_v17, 2 }
  0xb1   :  { %v51_v20 = vmax.f32 %v49_v16, %v50_v18  ;;  %v56_v21 = vmax.f32 %v54_v17, %v55_v19 }
  0xb3   :  { %v59_v22 = vsub.f32 %v39_v8, %v51_v20  ;;  %v57_v23 = vrot.slane %v56_v21, 1 }
  0xb5   :  { %v61_v24 = vmul.f32 1.442695, %v59_v22  ;;  %v58_v25 = vmax.f32 %v56_v21, %v57_v23 }
  0xb7   :  { %149 = vpow2.f32 %v61_v24  ;;  %v60_v26 = vsub.f32 %v43_v12, %v58_v25 }
  0xb9   :  { %v63_v27 = vmul.f32 1.442695, %v60_v26 }
  0xbb   :  { %151 = vpow2.f32 %v63_v27 }
  0xc1   :  { %v150_v28 = vpop.eup %149 }
  0xc2   :  { %v65_v29 = vsel %vm44_vm1, %v150_v28, 0.0  ;;  %81 = vperm.xlu1 %147, %v150_v28  }
  0xc3   :  { %v66_v30 = vrot.slane %v65_v29, 4 }
  0xc5   :  { %v152_v31 = vpop.eup %151  ;;  %v67_v32 = vadd.f32 %v66_v30, %v65_v29 }
  0xc6   :  { %v72_v33 = vsel %vm44_vm1, %v152_v31, 0.0  ;;  %86 = vperm.xlu1 %147, %v152_v31  }
  0xc7   :  { %v68_v34 = vrot.slane %v67_v32, 2  ;;  %v73_v35 = vrot.slane %v72_v33, 4 }
  0xc9   :  { %v69_v36 = vadd.f32 %v68_v34, %v67_v32  ;;  %v74_v37 = vadd.f32 %v73_v35, %v72_v33 }
  0xcb   :  { %v70_v38 = vrot.slane %v69_v36, 1  ;;  %v75_v39 = vrot.slane %v74_v37, 2 }
  0xcd   :  { %v71_v40 = vadd.f32 %v70_v38, %v69_v36  ;;  %v76_v41 = vadd.f32 %v75_v39, %v74_v37 }
  0xcf   :  { %153 = vrcp.f32 %v71_v40  ;;  %v77_v42 = vrot.slane %v76_v41, 1 }
  0xd1   :  { %v78_v43 = vadd.f32 %v77_v42, %v76_v41 }
  0xd3   :  { %155 = vrcp.f32 %v78_v43 }
  0xd9   :  { %v154_v44 = vpop.eup %153 }
  0xda   :  { %109 = vperm.xlu0 %148, %v154_v44  }
  0xdd   :  { %v156_v45 = vpop.eup %155 }
  0xde   :  { %114 = vperm.xlu1 %147, %v156_v45  }
 0x141   :  { %v82_v46 = vpop.permute.xlu1 %81 }
 0x142   :  { %v89_v47 = vmul.f32 %v82_v46, %v26_v0 }
 0x144   :  { %v91_v48 = vsel %vm36_vm0, %v89_v47, 0.0 }
 0x145   :  { %v87_v49 = vpop.permute.xlu1 %86  ;;  %v92_v51 = vrot.slane %v91_v48, 4 }
 0x146   :  { %v90_v50 = vmul.f32 %v87_v49, %v27_v2 }
 0x147   :  { %v93_v54 = vadd.f32 %v92_v51, %v91_v48 }
 0x148   :  { %v98_v52 = vsel %vm36_vm0, %v90_v50, 0.0 }
 0x149   :  { %v99_v53 = vrot.slane %v98_v52, 4  ;;  %v94_v56 = vrot.slane %v93_v54, 2 }
 0x14b   :  { %v100_v55 = vadd.f32 %v99_v53, %v98_v52  ;;  %v95_v58 = vadd.f32 %v94_v56, %v93_v54 }
 0x14d   :  { %v101_v57 = vrot.slane %v100_v55, 2  ;;  %v96_v60 = vrot.slane %v95_v58, 1 }
 0x14f   :  { %v102_v59 = vadd.f32 %v101_v57, %v100_v55  ;;  %v97_v63 = vadd.f32 %v96_v60, %v95_v58 }
 0x151   :  { %v103_v61 = vrot.slane %v102_v59, 1 }
 0x153   :  { %v104_v1 = vadd.f32 %v103_v61, %v102_v59 }
 0x159   :  { %v110_v62 = vpop.permute.xlu0 %109 }
 0x15a   :  { %v117_v2 = vmul.f32 %v110_v62, %v97_v63 }
 0x15d   :  { %v115_v0 = vpop.permute.xlu1 %114 }
 0x15e   :  { %v118_v3 = vmul.f32 %v115_v0, %v104_v1 }
 0x160   :  { %v122_v4 = vsel %vm121_vm2, %v118_v3, %v117_v2 }
 0x161   :  { %125 = vst.msk [vmem:[#allocation5] sm:$0x3] %vm124_vm3, %v122_v4 }
 0x162   :  { %190 = shalt.err (!%p187_p12)
}
 0x163   :  { %s191_s28 = scalar_lea.hbm %s262_s2, 32 }
 0x164   :  { %p192_p13 = scmp.ne.s32.totalorder %s262_s2, %s191_s28  ;;  %p195_p0 = scmp.lt.u32.totalorder %s191_s28, %s262_s2 }
 0x166   :  { %p197_p1 = pnand %p195_p0, %p192_p13 }
 0x168   :  { %200 = shalt.err (!%p197_p1)
}
 0x169   :  { %135 = dma.vmem_to_hbm [thread:$0]  %s133_s1, 32, %s262_s2, [#allocation4]  }
 0x16a   :  { %203 = dma.done.wait [#allocation4], 32  }
 0x16b   :  { %204 = vsyncadd [#allocation4], 4294967264 }
 0x16c   :  { %139 = vsyncpa [#allocation3], 1 }
 0x16d   :  { %140 = vsyncpa [#allocation4], 1 }

</bundles_post_ra>
